<compile_context>
chip_gen: v7x
topology: tpu7x:2x2x1
jax: 0.10.0
libtpu: 0.0.40
codegen_flags: <defaults>
</compile_context>

<pallas_src>
import functools

import jax
import jax.numpy as jnp
from jax import lax
from jax.experimental import pallas as pl
from jax.experimental.pallas import tpu as pltpu


def _mha_fused_kernel(xq_ref, xk_ref, xv_ref,
                      wq_ref, wk_ref, wv_ref,
                      bq_ref, bk_ref, bv_ref,
                      wo_ref, bo_ref,
                      o_ref, *, num_heads: int, query_dim: int,
                      value_dim: int, masking: bool):
    """One grid step = one batch element. All heads + output projection fused."""
    xq = xq_ref[0]          # (S, E)
    xk = xk_ref[0]          # (S, E)
    xv = xv_ref[0]          # (S, E)

    # Head-stacked linear projections: (S, E) @ (E, H*D) -> (S, H*D).
    q = jnp.dot(xq, wq_ref[...], preferred_element_type=jnp.float32) + bq_ref[...]  # (S, H*Dq)
    k = jnp.dot(xk, wk_ref[...], preferred_element_type=jnp.float32) + bk_ref[...]  # (S, H*Dq)
    v = jnp.dot(xv, wv_ref[...], preferred_element_type=jnp.float32) + bv_ref[...]  # (S, H*Dv)

    s_len = xq.shape[0]
    inv_scale = jnp.float32(1.0 / (query_dim ** 0.5))
    if masking:
        row = lax.broadcasted_iota(jnp.int32, (s_len, s_len), 0)
        col = lax.broadcasted_iota(jnp.int32, (s_len, s_len), 1)
        causal_mask = col > row

    head_outs = []
    for h in range(num_heads):                      # static unroll, H is small
        qh = q[:, h * query_dim:(h + 1) * query_dim]    # (S, Dq)
        kh = k[:, h * query_dim:(h + 1) * query_dim]    # (S, Dq)
        vh = v[:, h * value_dim:(h + 1) * value_dim]    # (S, Dv)

        # scores = q @ k^T, contracting last dims — no explicit transpose.
        scores = lax.dot_general(qh, kh, (((1,), (1,)), ((), ())),
                                 preferred_element_type=jnp.float32)         # (S, S)
        if masking:
            scores = jnp.where(causal_mask, -jnp.inf, scores)
        # Reference order: mask, then scale, then softmax.
        scores = scores * inv_scale

        # softmax (max-subtracted, exact normalization — see header note)
        m = jnp.max(scores, axis=-1, keepdims=True)
        e = jnp.exp(scores - m)
        p = e / jnp.sum(e, axis=-1, keepdims=True)

        head_outs.append(jnp.dot(p, vh, preferred_element_type=jnp.float32))  # (S, Dv)

    concat = jnp.concatenate(head_outs, axis=-1)    # (S, H*Dv)

    # Fused output projection — lane-dense (S, E) write.
    o_ref[0] = (jnp.dot(concat, wo_ref[...], preferred_element_type=jnp.float32)
                + bo_ref[...])


def multi_head_attention(query, key, value, params, *, masking: bool = False):
    """query/key/value: (B, S, E) float32."""
    B, S, E = query.shape
    wq, wk, wv = params["wq"], params["wk"], params["wv"]
    bq, bk, bv = params["bq"], params["bk"], params["bv"]
    w_out, b_out = params["w_out"], params["b_out"]
    H, _, Dq = wq.shape
    Dv = wv.shape[-1]

    # Stack per-head weights along the output-feature axis (trace-time, tiny).
    wq_s = jnp.transpose(wq, (1, 0, 2)).reshape(E, H * Dq)
    wk_s = jnp.transpose(wk, (1, 0, 2)).reshape(E, H * Dq)
    wv_s = jnp.transpose(wv, (1, 0, 2)).reshape(E, H * Dv)
    bq_s = bq.reshape(1, H * Dq)
    bk_s = bk.reshape(1, H * Dq)
    bv_s = bv.reshape(1, H * Dv)

    kernel = functools.partial(_mha_fused_kernel, num_heads=H, query_dim=Dq,
                               value_dim=Dv, masking=masking)

    x_spec = pl.BlockSpec((1, S, E), lambda b: (b, 0, 0))
    const2 = lambda b: (0, 0)

    out = pl.pallas_call(
        kernel,
        out_shape=jax.ShapeDtypeStruct((B, S, E), jnp.float32),
        grid=(B,),
        in_specs=[
            x_spec, x_spec, x_spec,                         # query, key, value
            pl.BlockSpec((E, H * Dq), const2),              # wq (head-stacked)
            pl.BlockSpec((E, H * Dq), const2),              # wk
            pl.BlockSpec((E, H * Dv), const2),              # wv
            pl.BlockSpec((1, H * Dq), const2),              # bq
            pl.BlockSpec((1, H * Dq), const2),              # bk
            pl.BlockSpec((1, H * Dv), const2),              # bv
            pl.BlockSpec((H * Dv, E), const2),              # w_out
            pl.BlockSpec((1, E), const2),                   # b_out
        ],
        out_specs=pl.BlockSpec((1, S, E), lambda b: (b, 0, 0)),
        compiler_params=pltpu.CompilerParams(
            dimension_semantics=("parallel",)),             # both TCs busy on v7x
    )(query, key, value, wq_s, wk_s, wv_s, bq_s, bk_s, bv_s, w_out, b_out)
    return out


def _reference(query, key, value, params, *, masking=False):
    """Plain-JAX reference mirroring the PyTorch forward pass."""
    wq, wk, wv = params["wq"], params["wk"], params["wv"]
    bq, bk, bv = params["bq"], params["bk"], params["bv"]
    w_out, b_out = params["w_out"], params["b_out"]
    H = wq.shape[0]
    heads = []
    for h in range(H):
        q = query @ wq[h] + bq[h]
        k = key @ wk[h] + bk[h]
        v = value @ wv[h] + bv[h]
        dot = jnp.einsum("bsd,btd->bst", q, k)
        if masking:
            S = dot.shape[1]
            m = jnp.triu(jnp.ones((S, S), bool), k=1)
            dot = jnp.where(m[None], -jnp.inf, dot)
        attn = jax.nn.softmax(dot / q.shape[-1] ** 0.5, axis=-1)
        heads.append(jnp.einsum("bst,btd->bsd", attn, v))
    concat = jnp.concatenate(heads, axis=-1)
    return concat @ w_out + b_out


def init_params(key, num_heads, embedding_dim, query_dim, value_dim):
    ks = jax.random.split(key, 8)
    scale = 1.0 / (embedding_dim ** 0.5)
    return {
        "wq": jax.random.normal(ks[0], (num_heads, embedding_dim, query_dim), jnp.float32) * scale,
        "wk": jax.random.normal(ks[1], (num_heads, embedding_dim, query_dim), jnp.float32) * scale,
        "wv": jax.random.normal(ks[2], (num_heads, embedding_dim, value_dim), jnp.float32) * scale,
        "bq": jax.random.normal(ks[3], (num_heads, 1, query_dim), jnp.float32) * 0.01,
        "bk": jax.random.normal(ks[4], (num_heads, 1, query_dim), jnp.float32) * 0.01,
        "bv": jax.random.normal(ks[5], (num_heads, 1, value_dim), jnp.float32) * 0.01,
        "w_out": jax.random.normal(ks[6], (num_heads * value_dim, embedding_dim), jnp.float32)
                 * (1.0 / (num_heads * value_dim) ** 0.5),
        "b_out": jax.random.normal(ks[7], (1, embedding_dim), jnp.float32) * 0.01,
    }


if __name__ == "__main__":
    # small shapes consistent with the module
    B, S, E = 2, 8, 32      # batch, seq, embedding_dim
    H, Dq, Dv = 4, 16, 16   # num_heads, query_dim, value_dim

    root = jax.random.PRNGKey(0)
    kq, kk, kv, kp = jax.random.split(root, 4)
    query = jax.random.normal(kq, (B, S, E), jnp.float32)
    key = jax.random.normal(kk, (B, S, E), jnp.float32)
    value = jax.random.normal(kv, (B, S, E), jnp.float32)
    params = init_params(kp, H, E, Dq, Dv)

    # module default (masking=False) and the causal path
    for masking in (False, True):
        out = multi_head_attention(query, key, value, params, masking=masking)
        out = jax.block_until_ready(out)
        ref = _reference(query, key, value, params, masking=masking)
        assert out.shape == (B, S, E)
        err = float(jnp.max(jnp.abs(out - ref)))
        assert jnp.allclose(out, ref, rtol=2e-3, atol=2e-3), \
            f"mismatch vs reference (masking={masking}, max_abs_err={err})"

    print("KERNEL_OK")
</pallas_src>

<mosaic_0001>
module attributes {stable_mosaic.version = 11 : i64} {
  func.func @_mha_fused_kernel(%arg0: i32, %arg1: memref<1x8x32xf32, #tpu.memory_space<vmem>>, %arg2: memref<1x8x32xf32, #tpu.memory_space<vmem>>, %arg3: memref<1x8x32xf32, #tpu.memory_space<vmem>>, %arg4: memref<32x64xf32, #tpu.memory_space<vmem>>, %arg5: memref<32x64xf32, #tpu.memory_space<vmem>>, %arg6: memref<32x64xf32, #tpu.memory_space<vmem>>, %arg7: memref<1x64xf32, #tpu.memory_space<vmem>>, %arg8: memref<1x64xf32, #tpu.memory_space<vmem>>, %arg9: memref<1x64xf32, #tpu.memory_space<vmem>>, %arg10: memref<64x32xf32, #tpu.memory_space<vmem>>, %arg11: memref<1x32xf32, #tpu.memory_space<vmem>>, %arg12: memref<1x8x32xf32, #tpu.memory_space<vmem>>) attributes {dimension_semantics = [#tpu.dimension_semantics<parallel>], iteration_bounds = array<i64: 2>, scalar_prefetch = 0 : i64, scratch_operands = 0 : i64, tpu.core_type = #tpu.core_type<tc>, window_params = [{transform_indices = @transform_0, window_bounds = array<i64: 1, 8, 32>}, {transform_indices = @transform_1, window_bounds = array<i64: 1, 8, 32>}, {transform_indices = @transform_2, window_bounds = array<i64: 1, 8, 32>}, {pipeline_mode = #tpu.pipeline_mode<synchronous>, transform_indices = @transform_3, window_bounds = array<i64: 32, 64>}, {pipeline_mode = #tpu.pipeline_mode<synchronous>, transform_indices = @transform_4, window_bounds = array<i64: 32, 64>}, {pipeline_mode = #tpu.pipeline_mode<synchronous>, transform_indices = @transform_5, window_bounds = array<i64: 32, 64>}, {pipeline_mode = #tpu.pipeline_mode<synchronous>, transform_indices = @transform_6, window_bounds = array<i64: 1, 64>}, {pipeline_mode = #tpu.pipeline_mode<synchronous>, transform_indices = @transform_7, window_bounds = array<i64: 1, 64>}, {pipeline_mode = #tpu.pipeline_mode<synchronous>, transform_indices = @transform_8, window_bounds = array<i64: 1, 64>}, {pipeline_mode = #tpu.pipeline_mode<synchronous>, transform_indices = @transform_9, window_bounds = array<i64: 64, 32>}, {pipeline_mode = #tpu.pipeline_mode<synchronous>, transform_indices = @transform_10, window_bounds = array<i64: 1, 32>}, {transform_indices = @transform_11, window_bounds = array<i64: 1, 8, 32>}]} {
    %c0 = arith.constant 0 : index
    %c0_0 = arith.constant 0 : index
    %c0_1 = arith.constant 0 : index
    %0 = vector.load %arg1[%c0, %c0_0, %c0_1] : memref<1x8x32xf32, #tpu.memory_space<vmem>>, vector<1x8x32xf32>
    %1 = vector.shape_cast %0 : vector<1x8x32xf32> to vector<8x32xf32>
    %c0_2 = arith.constant 0 : index
    %c0_3 = arith.constant 0 : index
    %c0_4 = arith.constant 0 : index
    %2 = vector.load %arg2[%c0_2, %c0_3, %c0_4] : memref<1x8x32xf32, #tpu.memory_space<vmem>>, vector<1x8x32xf32>
    %3 = vector.shape_cast %2 : vector<1x8x32xf32> to vector<8x32xf32>
    %c0_5 = arith.constant 0 : index
    %c0_6 = arith.constant 0 : index
    %c0_7 = arith.constant 0 : index
    %4 = vector.load %arg3[%c0_5, %c0_6, %c0_7] : memref<1x8x32xf32, #tpu.memory_space<vmem>>, vector<1x8x32xf32>
    %5 = vector.shape_cast %4 : vector<1x8x32xf32> to vector<8x32xf32>
    %c0_8 = arith.constant 0 : index
    %c0_9 = arith.constant 0 : index
    %6 = vector.load %arg4[%c0_8, %c0_9] : memref<32x64xf32, #tpu.memory_space<vmem>>, vector<32x64xf32>
    %cst = arith.constant dense<0.000000e+00> : vector<8x64xf32>
    %7 = tpu.matmul %1, %6, %cst {dimension_numbers = #tpu.dot_dimension_numbers<[1], [0], [0], [1], [0, 0, 1, 1], [], []>} : vector<8x32xf32>, vector<32x64xf32>, vector<8x64xf32> -> vector<8x64xf32>
    %c0_10 = arith.constant 0 : index
    %c0_11 = arith.constant 0 : index
    %8 = vector.load %arg7[%c0_10, %c0_11] : memref<1x64xf32, #tpu.memory_space<vmem>>, vector<1x64xf32>
    %9 = vector.broadcast %8 : vector<1x64xf32> to vector<8x64xf32>
    %10 = arith.addf %7, %9 : vector<8x64xf32>
    %c0_12 = arith.constant 0 : index
    %c0_13 = arith.constant 0 : index
    %11 = vector.load %arg5[%c0_12, %c0_13] : memref<32x64xf32, #tpu.memory_space<vmem>>, vector<32x64xf32>
    %cst_14 = arith.constant dense<0.000000e+00> : vector<8x64xf32>
    %12 = tpu.matmul %3, %11, %cst_14 {dimension_numbers = #tpu.dot_dimension_numbers<[1], [0], [0], [1], [0, 0, 1, 1], [], []>} : vector<8x32xf32>, vector<32x64xf32>, vector<8x64xf32> -> vector<8x64xf32>
    %c0_15 = arith.constant 0 : index
    %c0_16 = arith.constant 0 : index
    %13 = vector.load %arg8[%c0_15, %c0_16] : memref<1x64xf32, #tpu.memory_space<vmem>>, vector<1x64xf32>
    %14 = vector.broadcast %13 : vector<1x64xf32> to vector<8x64xf32>
    %15 = arith.addf %12, %14 : vector<8x64xf32>
    %c0_17 = arith.constant 0 : index
    %c0_18 = arith.constant 0 : index
    %16 = vector.load %arg6[%c0_17, %c0_18] : memref<32x64xf32, #tpu.memory_space<vmem>>, vector<32x64xf32>
    %cst_19 = arith.constant dense<0.000000e+00> : vector<8x64xf32>
    %17 = tpu.matmul %5, %16, %cst_19 {dimension_numbers = #tpu.dot_dimension_numbers<[1], [0], [0], [1], [0, 0, 1, 1], [], []>} : vector<8x32xf32>, vector<32x64xf32>, vector<8x64xf32> -> vector<8x64xf32>
    %c0_20 = arith.constant 0 : index
    %c0_21 = arith.constant 0 : index
    %18 = vector.load %arg9[%c0_20, %c0_21] : memref<1x64xf32, #tpu.memory_space<vmem>>, vector<1x64xf32>
    %19 = vector.broadcast %18 : vector<1x64xf32> to vector<8x64xf32>
    %20 = arith.addf %17, %19 : vector<8x64xf32>
    %21 = vector.extract_strided_slice %10 {offsets = [0, 0], sizes = [8, 16], strides = [1, 1]} : vector<8x64xf32> to vector<8x16xf32>
    %22 = vector.extract_strided_slice %15 {offsets = [0, 0], sizes = [8, 16], strides = [1, 1]} : vector<8x64xf32> to vector<8x16xf32>
    %23 = vector.extract_strided_slice %20 {offsets = [0, 0], sizes = [8, 16], strides = [1, 1]} : vector<8x64xf32> to vector<8x16xf32>
    %cst_22 = arith.constant dense<0.000000e+00> : vector<8x8xf32>
    %24 = tpu.matmul %21, %22, %cst_22 {dimension_numbers = #tpu.dot_dimension_numbers<[1], [1], [0], [0], [0, 0, 1, 0], [], []>} : vector<8x16xf32>, vector<8x16xf32>, vector<8x8xf32> -> vector<8x8xf32>
    %cst_23 = arith.constant 2.500000e-01 : f32
    %25 = vector.broadcast %cst_23 : f32 to vector<8x8xf32>
    %26 = arith.mulf %24, %25 : vector<8x8xf32>
    %cst_24 = arith.constant dense<0xFF800000> : vector<8xf32>
    %27 = vector.multi_reduction <maximumf>, %26, %cst_24 [1] : vector<8x8xf32> to vector<8xf32>
    %28 = vector.shape_cast %27 : vector<8xf32> to vector<8x1xf32>
    %29 = vector.broadcast %28 : vector<8x1xf32> to vector<8x8xf32>
    %30 = arith.subf %26, %29 : vector<8x8xf32>
    %31 = math.exp %30 : vector<8x8xf32>
    %cst_25 = arith.constant dense<0.000000e+00> : vector<8xf32>
    %32 = vector.multi_reduction <add>, %31, %cst_25 [1] : vector<8x8xf32> to vector<8xf32>
    %33 = vector.shape_cast %32 : vector<8xf32> to vector<8x1xf32>
    %34 = vector.broadcast %33 : vector<8x1xf32> to vector<8x8xf32>
    %35 = arith.divf %31, %34 : vector<8x8xf32>
    %cst_26 = arith.constant dense<0.000000e+00> : vector<8x16xf32>
    %36 = tpu.matmul %35, %23, %cst_26 {dimension_numbers = #tpu.dot_dimension_numbers<[1], [0], [0], [1], [0, 0, 1, 1], [], []>} : vector<8x8xf32>, vector<8x16xf32>, vector<8x16xf32> -> vector<8x16xf32>
    %37 = vector.extract_strided_slice %10 {offsets = [0, 16], sizes = [8, 16], strides = [1, 1]} : vector<8x64xf32> to vector<8x16xf32>
    %38 = vector.extract_strided_slice %15 {offsets = [0, 16], sizes = [8, 16], strides = [1, 1]} : vector<8x64xf32> to vector<8x16xf32>
    %39 = vector.extract_strided_slice %20 {offsets = [0, 16], sizes = [8, 16], strides = [1, 1]} : vector<8x64xf32> to vector<8x16xf32>
    %cst_27 = arith.constant dense<0.000000e+00> : vector<8x8xf32>
    %40 = tpu.matmul %37, %38, %cst_27 {dimension_numbers = #tpu.dot_dimension_numbers<[1], [1], [0], [0], [0, 0, 1, 0], [], []>} : vector<8x16xf32>, vector<8x16xf32>, vector<8x8xf32> -> vector<8x8xf32>
    %cst_28 = arith.constant 2.500000e-01 : f32
    %41 = vector.broadcast %cst_28 : f32 to vector<8x8xf32>
    %42 = arith.mulf %40, %41 : vector<8x8xf32>
    %cst_29 = arith.constant dense<0xFF800000> : vector<8xf32>
    %43 = vector.multi_reduction <maximumf>, %42, %cst_29 [1] : vector<8x8xf32> to vector<8xf32>
    %44 = vector.shape_cast %43 : vector<8xf32> to vector<8x1xf32>
    %45 = vector.broadcast %44 : vector<8x1xf32> to vector<8x8xf32>
    %46 = arith.subf %42, %45 : vector<8x8xf32>
    %47 = math.exp %46 : vector<8x8xf32>
    %cst_30 = arith.constant dense<0.000000e+00> : vector<8xf32>
    %48 = vector.multi_reduction <add>, %47, %cst_30 [1] : vector<8x8xf32> to vector<8xf32>
    %49 = vector.shape_cast %48 : vector<8xf32> to vector<8x1xf32>
    %50 = vector.broadcast %49 : vector<8x1xf32> to vector<8x8xf32>
    %51 = arith.divf %47, %50 : vector<8x8xf32>
    %cst_31 = arith.constant dense<0.000000e+00> : vector<8x16xf32>
    %52 = tpu.matmul %51, %39, %cst_31 {dimension_numbers = #tpu.dot_dimension_numbers<[1], [0], [0], [1], [0, 0, 1, 1], [], []>} : vector<8x8xf32>, vector<8x16xf32>, vector<8x16xf32> -> vector<8x16xf32>
    %53 = vector.extract_strided_slice %10 {offsets = [0, 32], sizes = [8, 16], strides = [1, 1]} : vector<8x64xf32> to vector<8x16xf32>
    %54 = vector.extract_strided_slice %15 {offsets = [0, 32], sizes = [8, 16], strides = [1, 1]} : vector<8x64xf32> to vector<8x16xf32>
    %55 = vector.extract_strided_slice %20 {offsets = [0, 32], sizes = [8, 16], strides = [1, 1]} : vector<8x64xf32> to vector<8x16xf32>
    %cst_32 = arith.constant dense<0.000000e+00> : vector<8x8xf32>
    %56 = tpu.matmul %53, %54, %cst_32 {dimension_numbers = #tpu.dot_dimension_numbers<[1], [1], [0], [0], [0, 0, 1, 0], [], []>} : vector<8x16xf32>, vector<8x16xf32>, vector<8x8xf32> -> vector<8x8xf32>
    %cst_33 = arith.constant 2.500000e-01 : f32
    %57 = vector.broadcast %cst_33 : f32 to vector<8x8xf32>
    %58 = arith.mulf %56, %57 : vector<8x8xf32>
    %cst_34 = arith.constant dense<0xFF800000> : vector<8xf32>
    %59 = vector.multi_reduction <maximumf>, %58, %cst_34 [1] : vector<8x8xf32> to vector<8xf32>
    %60 = vector.shape_cast %59 : vector<8xf32> to vector<8x1xf32>
    %61 = vector.broadcast %60 : vector<8x1xf32> to vector<8x8xf32>
    %62 = arith.subf %58, %61 : vector<8x8xf32>
    %63 = math.exp %62 : vector<8x8xf32>
    %cst_35 = arith.constant dense<0.000000e+00> : vector<8xf32>
    %64 = vector.multi_reduction <add>, %63, %cst_35 [1] : vector<8x8xf32> to vector<8xf32>
    %65 = vector.shape_cast %64 : vector<8xf32> to vector<8x1xf32>
    %66 = vector.broadcast %65 : vector<8x1xf32> to vector<8x8xf32>
    %67 = arith.divf %63, %66 : vector<8x8xf32>
    %cst_36 = arith.constant dense<0.000000e+00> : vector<8x16xf32>
    %68 = tpu.matmul %67, %55, %cst_36 {dimension_numbers = #tpu.dot_dimension_numbers<[1], [0], [0], [1], [0, 0, 1, 1], [], []>} : vector<8x8xf32>, vector<8x16xf32>, vector<8x16xf32> -> vector<8x16xf32>
    %69 = vector.extract_strided_slice %10 {offsets = [0, 48], sizes = [8, 16], strides = [1, 1]} : vector<8x64xf32> to vector<8x16xf32>
    %70 = vector.extract_strided_slice %15 {offsets = [0, 48], sizes = [8, 16], strides = [1, 1]} : vector<8x64xf32> to vector<8x16xf32>
    %71 = vector.extract_strided_slice %20 {offsets = [0, 48], sizes = [8, 16], strides = [1, 1]} : vector<8x64xf32> to vector<8x16xf32>
    %cst_37 = arith.constant dense<0.000000e+00> : vector<8x8xf32>
    %72 = tpu.matmul %69, %70, %cst_37 {dimension_numbers = #tpu.dot_dimension_numbers<[1], [1], [0], [0], [0, 0, 1, 0], [], []>} : vector<8x16xf32>, vector<8x16xf32>, vector<8x8xf32> -> vector<8x8xf32>
    %cst_38 = arith.constant 2.500000e-01 : f32
    %73 = vector.broadcast %cst_38 : f32 to vector<8x8xf32>
    %74 = arith.mulf %72, %73 : vector<8x8xf32>
    %cst_39 = arith.constant dense<0xFF800000> : vector<8xf32>
    %75 = vector.multi_reduction <maximumf>, %74, %cst_39 [1] : vector<8x8xf32> to vector<8xf32>
    %76 = vector.shape_cast %75 : vector<8xf32> to vector<8x1xf32>
    %77 = vector.broadcast %76 : vector<8x1xf32> to vector<8x8xf32>
    %78 = arith.subf %74, %77 : vector<8x8xf32>
    %79 = math.exp %78 : vector<8x8xf32>
    %cst_40 = arith.constant dense<0.000000e+00> : vector<8xf32>
    %80 = vector.multi_reduction <add>, %79, %cst_40 [1] : vector<8x8xf32> to vector<8xf32>
    %81 = vector.shape_cast %80 : vector<8xf32> to vector<8x1xf32>
    %82 = vector.broadcast %81 : vector<8x1xf32> to vector<8x8xf32>
    %83 = arith.divf %79, %82 : vector<8x8xf32>
    %cst_41 = arith.constant dense<0.000000e+00> : vector<8x16xf32>
    %84 = tpu.matmul %83, %71, %cst_41 {dimension_numbers = #tpu.dot_dimension_numbers<[1], [0], [0], [1], [0, 0, 1, 1], [], []>} : vector<8x8xf32>, vector<8x16xf32>, vector<8x16xf32> -> vector<8x16xf32>
    %85 = tpu.concatenate %36, %52, %68, %84 in 1 : vector<8x16xf32>, vector<8x16xf32>, vector<8x16xf32>, vector<8x16xf32> -> vector<8x64xf32>
    %c0_42 = arith.constant 0 : index
    %c0_43 = arith.constant 0 : index
    %86 = vector.load %arg10[%c0_42, %c0_43] : memref<64x32xf32, #tpu.memory_space<vmem>>, vector<64x32xf32>
    %cst_44 = arith.constant dense<0.000000e+00> : vector<8x32xf32>
    %87 = tpu.matmul %85, %86, %cst_44 {dimension_numbers = #tpu.dot_dimension_numbers<[1], [0], [0], [1], [0, 0, 1, 1], [], []>} : vector<8x64xf32>, vector<64x32xf32>, vector<8x32xf32> -> vector<8x32xf32>
    %c0_45 = arith.constant 0 : index
    %c0_46 = arith.constant 0 : index
    %88 = vector.load %arg11[%c0_45, %c0_46] : memref<1x32xf32, #tpu.memory_space<vmem>>, vector<1x32xf32>
    %89 = vector.broadcast %88 : vector<1x32xf32> to vector<8x32xf32>
    %90 = arith.addf %87, %89 : vector<8x32xf32>
    %c0_47 = arith.constant 0 : index
    %c0_48 = arith.constant 0 : index
    %c0_49 = arith.constant 0 : index
    %91 = vector.load %arg12[%c0_47, %c0_48, %c0_49] : memref<1x8x32xf32, #tpu.memory_space<vmem>>, vector<1x8x32xf32>
    %92 = vector.shape_cast %91 : vector<1x8x32xf32> to vector<8x32xf32>
    %93 = vector.shape_cast %90 : vector<8x32xf32> to vector<1x8x32xf32>
    tpu.vector_store %arg12[%c0_47, %c0_48, %c0_49], %93 {strides = array<i32>} : memref<1x8x32xf32, #tpu.memory_space<vmem>>, vector<1x8x32xf32>,
    return
  }
  func.func @transform_0(%arg0: i32) -> (i32, i32, i32) {
    %c0_i32 = arith.constant 0 : i32
    %c0_i32_0 = arith.constant 0 : i32
    %c0_i32_1 = arith.constant 0 : i32
    return %arg0, %c0_i32, %c0_i32_0 : i32, i32, i32
  }
  func.func @transform_1(%arg0: i32) -> (i32, i32, i32) {
    %c0_i32 = arith.constant 0 : i32
    %c0_i32_0 = arith.constant 0 : i32
    %c0_i32_1 = arith.constant 0 : i32
    return %arg0, %c0_i32, %c0_i32_0 : i32, i32, i32
  }
  func.func @transform_2(%arg0: i32) -> (i32, i32, i32) {
    %c0_i32 = arith.constant 0 : i32
    %c0_i32_0 = arith.constant 0 : i32
    %c0_i32_1 = arith.constant 0 : i32
    return %arg0, %c0_i32, %c0_i32_0 : i32, i32, i32
  }
  func.func @transform_3(%arg0: i32) -> (i32, i32) {
    %c0_i32 = arith.constant 0 : i32
    %c0_i32_0 = arith.constant 0 : i32
    %c0_i32_1 = arith.constant 0 : i32
    return %c0_i32, %c0_i32_0 : i32, i32
  }
  func.func @transform_4(%arg0: i32) -> (i32, i32) {
    %c0_i32 = arith.constant 0 : i32
    %c0_i32_0 = arith.constant 0 : i32
    %c0_i32_1 = arith.constant 0 : i32
    return %c0_i32, %c0_i32_0 : i32, i32
  }
  func.func @transform_5(%arg0: i32) -> (i32, i32) {
    %c0_i32 = arith.constant 0 : i32
    %c0_i32_0 = arith.constant 0 : i32
    %c0_i32_1 = arith.constant 0 : i32
    return %c0_i32, %c0_i32_0 : i32, i32
  }
  func.func @transform_6(%arg0: i32) -> (i32, i32) {
    %c0_i32 = arith.constant 0 : i32
    %c0_i32_0 = arith.constant 0 : i32
    %c0_i32_1 = arith.constant 0 : i32
    return %c0_i32, %c0_i32_0 : i32, i32
  }
  func.func @transform_7(%arg0: i32) -> (i32, i32) {
    %c0_i32 = arith.constant 0 : i32
    %c0_i32_0 = arith.constant 0 : i32
    %c0_i32_1 = arith.constant 0 : i32
    return %c0_i32, %c0_i32_0 : i32, i32
  }
  func.func @transform_8(%arg0: i32) -> (i32, i32) {
    %c0_i32 = arith.constant 0 : i32
    %c0_i32_0 = arith.constant 0 : i32
    %c0_i32_1 = arith.constant 0 : i32
    return %c0_i32, %c0_i32_0 : i32, i32
  }
  func.func @transform_9(%arg0: i32) -> (i32, i32) {
    %c0_i32 = arith.constant 0 : i32
    %c0_i32_0 = arith.constant 0 : i32
    %c0_i32_1 = arith.constant 0 : i32
    return %c0_i32, %c0_i32_0 : i32, i32
  }
  func.func @transform_10(%arg0: i32) -> (i32, i32) {
    %c0_i32 = arith.constant 0 : i32
    %c0_i32_0 = arith.constant 0 : i32
    %c0_i32_1 = arith.constant 0 : i32
    return %c0_i32, %c0_i32_0 : i32, i32
  }
  func.func @transform_11(%arg0: i32) -> (i32, i32, i32) {
    %c0_i32 = arith.constant 0 : i32
    %c0_i32_0 = arith.constant 0 : i32
    %c0_i32_1 = arith.constant 0 : i32
    return %arg0, %c0_i32, %c0_i32_0 : i32, i32, i32
  }
}

</mosaic_0001>

<bundles_post_ra>
// kernel: tpu_custom_call.1
= control target key start
LH: loop header
LB: loop body
LE: loop exit
PB: predicated region body
PF: predicated region fallthrough
CT: control target
= control target key end

     0   :  { %s2642_s0 = inlined_call_operand.hbm [shape: f32[2,8,32], index: 0, kind: input, shape index: {}]   ;;  %s2643_s1 = inlined_call_operand.hbm [shape: f32[2,8,32], index: 1, kind: input, shape index: {}]   ;;  %s2644_s2 = inlined_call_operand.hbm [shape: f32[2,8,32], index: 2, kind: input, shape index: {}]   ;;  %s2645_s3 = inlined_call_operand.vmem [shape: f32[32,64], index: 3, kind: input, shape index: {}]   ;;  %s2646_s4 = inlined_call_operand.vmem [shape: f32[32,64], index: 4, kind: input, shape index: {}]   ;;  %s2647_s5 = inlined_call_operand.vmem [shape: f32[32,64], index: 5, kind: input, shape index: {}]   ;;  %s2648_s6 = inlined_call_operand.vmem [shape: f32[1,64], index: 6, kind: input, shape index: {}]   ;;  %s2649_s7 = inlined_call_operand.vmem [shape: f32[1,64], index: 7, kind: input, shape index: {}]   ;;  %s2650_s8 = inlined_call_operand.hbm [shape: f32[1,64], index: 8, kind: input, shape index: {}]   ;;  %s2651_s9 = inlined_call_operand.vmem [shape: f32[64,32], index: 9, kind: input, shape index: {}]   ;;  %s2652_s10 = inlined_call_operand.vmem [shape: f32[1,32], index: 10, kind: input, shape index: {}]   ;;  %s2653_s11 = inlined_call_operand.hbm [shape: f32[2,8,32], index: 11, kind: output, shape index: {}]  }
   0x1   :  { %2673 = sst [smem:[#allocation22_spill]] %s2642_s0 }
   0x2   :  { %2674 = sst [smem:[#allocation23_spill]] %s2643_s1 }
   0x3   :  { %2675 = sst [smem:[#allocation24_spill]] %s2651_s9 }
   0x4   :  { %2676 = sst [smem:[#allocation25_spill]] %s2652_s10 }
   0x5   :  { %2677 = sst [smem:[#allocation26_spill]] %s2653_s11 }
   0x6   :  { %16 = vsyncpa [#allocation3], 0 }
   0x7   :  { %18 = vsyncpa [#allocation3 + $0x1], 0 }
   0x8   :  { %19 = vsyncpa [#allocation6], 0 }
   0x9   :  { %21 = vsyncpa [#allocation6 + $0x1], 0 }
   0xa   :  { %22 = vsyncpa [#allocation9], 0 }
   0xb   :  { %23 = vsyncpa [#allocation4], 0 }
   0xc   :  { %25 = vsyncpa [#allocation4 + $0x1], 0  ;;  %s2209_s17 = smov 0   ;;  %s2211_s18 = smov 0  }
   0xd   :  { %s2213_s19 = smov 0   ;;  %s2215_s20 = smov 0  }
   0xe LB: > { %2678 = sst [smem:[#allocation15_spill]] %s2121_s17  ;;  %s2230_s21 = sadd.s32 1, %s2133_s20   ;;  %s2133_s20 = sphi %s2215_s20, %s2713_s20   ;;  %s2129_s19 = sphi %s2213_s19, %s2715_s19   ;;  %s2125_s18 = sphi %s2211_s18, %s2717_s18   ;;  %s2121_s17 = sphi %s2209_s17, %s2716_s17  }
   0xf   : > { %2679 = sst [smem:[#allocation16_spill]] %s2129_s19  ;;  %s38_s22 = sadd.s32 1, %s2129_s19 }
  0x10   : > { %2680 = sst [smem:[#allocation17_spill]] %s2133_s20  ;;  %s35_s23 = ssub.s32 %s2133_s20, %s2230_s21 }
  0x11   : > { %2681 = sst [smem:[#allocation18_spill]] %s2230_s21  ;;  %p2655_p0 = scmp.ne.s32.totalorder %s2129_s19, %s2125_s18 }
  0x12   : > { %p36_p1 = scmp.eq.s32.totalorder %s35_s23, 0  ;;  %p46_p2 = scmp.eq.s32.totalorder %s2133_s20, 0 }
  0x13   : > { %p1880_p4 = scmp.lt.s32.totalorder %s2133_s20, 2  ;;  %s2654_s25 = sand.u32 1, %s2129_s19  }
  0x14   : > { %s2241_s24 = scalar_select %p36_p1, %s2129_s19, %s38_s22  }
  0x15   : > { %p47_p5 = por %p46_p2, %p2655_p0  ;;  %s2249_s26 = sshll.u32 %s2654_s25, 3 }
  0x16   : > { %2682 = sst [smem:[#allocation19_spill]] %s2241_s24  ;;  %s2252_s27 = sshll.u32 %s2133_s20, 7 }
  0x17   : > { %p2254_p6 = pnand %p1880_p4, %p47_p5  ;;  %s371_s29 = sand.u32 1, %s2133_s20  }
  0x18   : > { %s2684_s1 = sld [smem:[#allocation23_spill]]  ;;  %s375_s14 = scalar_lea.vmem [#allocation5], %s2249_s26 }
  0x19   : > { %s2683_s28 = scalar_select %p2254_p6, 1, 0 }
  0x1a   : > { %s382_s15 = sshll.u32 %s375_s14, 4  ;;  %s2268_s16 = scalar_lea.sflag [#allocation6], %s371_s29  ;;  %s2266_s15 = int_to_ptr.vmem [resolvable:$true] %s382_s15 }
  0x1b   : > { %p2274_p8 = pneg %p2254_p6 }
  0x1e   : > { %s2263_s13 = scalar_lea.hbm %s2684_s1, %s2252_s27  ;;  %s1946_s25 = scalar_lea.hbm %s2684_s1, 256 }
  0x1f   : > { %s1941_s22 = scalar_lea.hbm %s2263_s13, 128  ;;  %p1947_p11 = scmp.lt.u32.totalorder %s2263_s13, %s2684_s1 }
  0x20   : > { %p1942_p7 = scmp.ne.s32.totalorder %s2263_s13, %s1941_s22  ;;  %p1948_p12 = scmp.lt.u32.totalorder %s1946_s25, %s1941_s22 }
  0x21   : > { %p1950_p1 = scmp.lt.u32.totalorder %s1941_s22, %s2263_s13 }
  0x22   : > { %p1944_p9 = pnand %p2274_p8, %p1942_p7  ;;  %p1949_p13 = por %p1948_p12, %p1947_p11 }
  0x24   : > { %p1945_p10 = pneg %p1944_p9  ;;  %p1951_p2 = por %p1950_p1, %p1949_p13 }
  0x26   : > { %p1952_p4 = pnand %p1951_p2, %p1945_p10 }
  0x28   : > { %1955 = shalt.err (!%p1952_p4)
}
  0x29   : > { %s1956_s29 = scalar_lea.vmem %s2266_s15, 128  ;;  %s2135_s30 = smov [#allocation5]  }
  0x2a   : > { %p1957_p5 = scmp.ne.s32.totalorder %s2266_s15, %s1956_s29  ;;  %s1961_s12 = sshll.u32 %s2135_s30, 4  ;;  %s1962_s12 = int_to_ptr.vmem [resolvable:$false] %s1961_s12 }
  0x2b   : > { %s1963_s24 = scalar_lea.vmem %s1962_s12, 256  ;;  %p1964_p3 = scmp.lt.s32.totalorder %s2266_s15, %s1962_s12 }
  0x2c   : > { %p1959_p7 = pnand %p1957_p5, %p2274_p8  ;;  %p1965_p0 = scmp.lt.s32.totalorder %s1963_s24, %s1956_s29 }
  0x2e   : > { %p1960_p9 = pneg %p1959_p7  ;;  %p1966_p11 = por %p1965_p0, %p1964_p3 }
  0x30   : > { %p1967_p12 = pnand %p1966_p11, %p1960_p9 }
  0x32   : > { %1970 = shalt.err (!%p1967_p12)
}
  0x33   : > { %1871 = dma.hbm_to_vmem [thread:$0]  (!%p2254_p6), %s2263_s13, 128, %s2266_s15, %s2268_s16  }
  0x34   : > { %s2299_s25 = sadd.s32 4294967295, %s2133_s20   ;;  %s1647_s22 = sadd.s32 4294967294, %s2133_s20  }
  0x35   : > { %p51_p0 = scmp.ne.s32.totalorder %s2125_s18, %s2121_s17  ;;  %p2665_p3 = scmp.eq.s32.totalorder %s2299_s25, 0 }
  0x36   : > { %p295_p10 = scmp.eq.s32.totalorder %s2299_s25, 1  ;;  %p301_p13 = scmp.eq.s32.totalorder %s1647_s22, 1 }
  0x37   : > { %p2308_p1 = por %p2665_p3, %p51_p0  ;;  %p1648_p2 = scmp.ge.s32.totalorder %s2133_s20, 1 }
  0x38   : > { %p2687_p4 = scmp.ne.s32.totalorder %s2129_s19, %s2125_s18  ;;  %p2320_p7 = por %p301_p13, %p51_p0 }
  0x39   : > { %s2686_s14 = scalar_select %p2308_p1, 1, 0 }
  0x3a   : > { %p2316_p5 = por %p295_p10, %p2687_p4  ;;  %p308_p9 = scmp.lt.s32.totalorder %s2133_s20, 3 }
  0x3b   : > { %s2690_s15 = scalar_select %p2320_p7, 1, 0 }
  0x3c   : > { %s2688_s13 = scalar_select %p2316_p5, 1, 0 }
  0x3d   : > { %2691 = sst [smem:[#allocation21_spill]] %s2690_s15  ;;  %p2325_p11 = pnand %p1648_p2, %p308_p9 }
  0x3e   : > { %2689 = sst [smem:[#allocation20_spill]] %s2688_s13  ;;  %s2136_s30 = smov [#allocation8]  }
  0x3f   : > { %s2692_s29 = scalar_select %p2325_p11, 1, 0 }
  0x40   : > { %s336_s12 = sshll.u32 %s2136_s30, 4  ;;  %p1861_p12 = pneg %p2325_p11  ;;  %s2329_s12 = int_to_ptr.vmem [resolvable:$true] %s336_s12 }
  0x41   : > { %s2693_s0 = sld [smem:[#allocation22_spill]]  ;;  %s357_s21 = scalar_lea.vmem [#allocation2], %s2249_s26 }
  0x42   : > { %s364_s20 = sshll.u32 %s357_s21, 4  ;;  %p2342_p0 = pnand %p1861_p12, %p2665_p3  ;;  %s365_s20 = int_to_ptr.vmem [resolvable:$true] %s364_s20 }
  0x43   : > { %s2695_s30 = sand.u32 1, %s2129_s19  }
  0x44   : > { %s2694_s15 = scalar_select %p2342_p0, 1, 0 }
  0x45   : > { %s354_s17 = scalar_lea.sflag [#allocation3], %s2695_s30 }
  0x47   : > { %s2337_s1 = scalar_lea.hbm %s2693_s0, %s2252_s27  ;;  %s1976_s10 = scalar_lea.hbm %s2693_s0, 256 }
  0x48   : > { %s1971_s11 = scalar_lea.hbm %s2337_s1, 128  ;;  %p1977_p4 = scmp.lt.u32.totalorder %s2337_s1, %s2693_s0 }
  0x49   : > { %p1972_p10 = scmp.ne.s32.totalorder %s2337_s1, %s1971_s11  ;;  %p1978_p9 = scmp.lt.u32.totalorder %s1976_s10, %s1971_s11 }
  0x4a   : > { %p1980_p3 = scmp.lt.u32.totalorder %s1971_s11, %s2337_s1 }
  0x4b   : > { %p1974_p13 = pnand %p1972_p10, %p2274_p8  ;;  %p1979_p12 = por %p1978_p9, %p1977_p4 }
  0x4d   : > { %p1975_p2 = pneg %p1974_p13  ;;  %p1981_p7 = por %p1980_p3, %p1979_p12 }
  0x4f   : > { %p1982_p5 = pnand %p1981_p7, %p1975_p2 }
  0x51   : > { %1985 = shalt.err (!%p1982_p5)
}
  0x52   : > { %s1986_s21 = scalar_lea.vmem %s365_s20, 128  ;;  %s2137_s30 = smov [#allocation2]  }
  0x53   : > { %p1987_p1 = scmp.ne.s32.totalorder %s365_s20, %s1986_s21  ;;  %s1991_s19 = sshll.u32 %s2137_s30, 4  ;;  %s1992_s19 = int_to_ptr.vmem [resolvable:$false] %s1991_s19 }
  0x54   : > { %s1993_s24 = scalar_lea.vmem %s1992_s19, 256  ;;  %p1994_p11 = scmp.lt.s32.totalorder %s365_s20, %s1992_s19 }
  0x55   : > { %p1989_p10 = pnand %p1987_p1, %p2274_p8  ;;  %p1995_p0 = scmp.lt.s32.totalorder %s1993_s24, %s1986_s21 }
  0x57   : > { %p1990_p13 = pneg %p1989_p10  ;;  %p1996_p6 = por %p1995_p0, %p1994_p11 }
  0x59   : > { %p1997_p4 = pnand %p1996_p6, %p1990_p13 }
  0x5b   : > { %2000 = shalt.err (!%p1997_p4)
}
  0x5c   : > { %p2696_p9 = scmp.ne.s32.totalorder %s2683_s28, 0  ;;  %s2369_s11 = scalar_lea.hbm %s2644_s2, %s2252_s27 }
  0x5d   : > { %s2001_s30 = scalar_lea.hbm %s2650_s8, 16  ;;  %p2697_p3 = scmp.ne.s32.totalorder %s2694_s15, 0 }
  0x5e   : > { %1868 = dma.hbm_to_vmem [thread:$0]  (!%p2696_p9), %s2337_s1, 128, %s365_s20, %s354_s17  }
  0x5f   : > { %p2002_p6 = scmp.ne.s32.totalorder %s2650_s8, %s2001_s30  ;;  %p2003_p1 = pneg %p2697_p3 }
  0x60   : > { %p2008_p11 = scmp.lt.u32.totalorder %s2001_s30, %s2650_s8 }
  0x61   : > { %p2004_p5 = pnand %p2003_p1, %p2002_p6 }
  0x63   : > { %p2005_p7 = pneg %p2004_p5 }
  0x65   : > { %p2010_p0 = pnand %p2008_p11, %p2005_p7 }
  0x67   : > { %2013 = shalt.err (!%p2010_p0)
}
  0x68   : > { %s2014_s1 = scalar_lea.vmem %s2329_s12, 16  ;;  %s2021_s17 = scalar_lea.vmem %s2329_s12, 32 }
  0x69   : > { %p2015_p2 = scmp.ne.s32.totalorder %s2329_s12, %s2014_s1  ;;  %p2022_p13 = scmp.lt.s32.totalorder %s2329_s12, %s2329_s12 }
  0x6a   : > { %p2023_p4 = scmp.lt.s32.totalorder %s2021_s17, %s2014_s1 }
  0x6b   : > { %p2017_p12 = pnand %p2015_p2, %p2003_p1 }
  0x6c   : > { %p2024_p6 = por %p2023_p4, %p2022_p13 }
  0x6d   : > { %p2018_p10 = pneg %p2017_p12 }
  0x6f   : > { %p2025_p5 = pnand %p2024_p6, %p2018_p10 }
  0x71   : > { %2028 = shalt.err (!%p2025_p5)
}
  0x72   : > { %1864 = dma.hbm_to_vmem [thread:$0]  (!%p2697_p3), %s2650_s8, 16, %s2329_s12, [#allocation9]  }
  0x73   : > { %s393_s27 = scalar_lea.vmem [#allocation7], %s2249_s26  ;;  %s2029_s10 = scalar_lea.hbm %s2369_s11, 128 }
  0x74   : > { %s400_s9 = sshll.u32 %s393_s27, 4  ;;  %p2030_p1 = scmp.ne.s32.totalorder %s2369_s11, %s2029_s10  ;;  %s401_s9 = int_to_ptr.vmem [resolvable:$true] %s400_s9 }
  0x75   : > { %s2034_s22 = scalar_lea.hbm %s2644_s2, 256  ;;  %p2035_p0 = scmp.lt.u32.totalorder %s2369_s11, %s2644_s2 }
  0x76   : > { %p2032_p7 = pnand %p2030_p1, %p2274_p8  ;;  %p2036_p2 = scmp.lt.u32.totalorder %s2034_s22, %s2029_s10 }
  0x77   : > { %p2038_p10 = scmp.lt.u32.totalorder %s2029_s10, %s2369_s11 }
  0x78   : > { %p2033_p11 = pneg %p2032_p7  ;;  %p2037_p12 = por %p2036_p2, %p2035_p0 }
  0x7a   : > { %p2039_p3 = por %p2038_p10, %p2037_p12 }
  0x7c   : > { %p2040_p13 = pnand %p2039_p3, %p2033_p11 }
  0x7e   : > { %2043 = shalt.err (!%p2040_p13)
}
  0x7f   : > { %s2044_s26 = scalar_lea.vmem %s401_s9, 128  ;;  %s2138_s12 = smov [#allocation7]  }
  0x80   : > { %p2045_p4 = scmp.ne.s32.totalorder %s401_s9, %s2044_s26  ;;  %s2049_s21 = sshll.u32 %s2138_s12, 4  ;;  %s2050_s21 = int_to_ptr.vmem [resolvable:$false] %s2049_s21 }
  0x81   : > { %s2051_s24 = scalar_lea.vmem %s2050_s21, 256  ;;  %p2052_p1 = scmp.lt.s32.totalorder %s401_s9, %s2050_s21 }
  0x82   : > { %p2047_p6 = pnand %p2045_p4, %p2274_p8  ;;  %p2053_p7 = scmp.lt.s32.totalorder %s2051_s24, %s2044_s26 }
  0x84   : > { %p2048_p5 = pneg %p2047_p6  ;;  %p2054_p9 = por %p2053_p7, %p2052_p1 }
  0x86   : > { %p2055_p0 = pnand %p2054_p9, %p2048_p5 }
  0x88   : > { %2058 = shalt.err (!%p2055_p0)
}
  0x89   : > { %p2698_p2 = scmp.ne.s32.totalorder %s2683_s28, 0  ;;  %p2699_p11 = scmp.ne.s32.totalorder %s2692_s29, 0 }
  0x8a   : > { %s2415_s23 = sand.u32 (!%p2699_p11), 1, %s2125_s18   ;;  %p2700_p8 = scmp.ne.s32.totalorder (!%p2699_p11), %s2686_s14, 0 }
  0x8b   : > { %1874 = dma.hbm_to_vmem [thread:$0]  (!%p2698_p2), %s2369_s11, 128, %s401_s9, %s2268_s16  }
  0x8c   : > { %409 = sbr.rel (%p2699_p11) target bundleno = 1598 (0x63e), region = 64  ;;  %s2418_s1 = sshll.u32 (!%p2699_p11), %s2415_s23, 3 }
  0x8d   : > { %s412_s17 = scalar_lea.sflag (!%p2699_p11), [#allocation3], %s2415_s23  ;;  %s415_s0 = scalar_lea.vmem (!%p2699_p11), [#allocation2], %s2418_s1 }
  0x93   : > { %2104 = dma.done.wait (%p2700_p8), %s412_s17, 128  }
  0x94   : > { %2106 = vsyncadd (%p2700_p8), %s412_s17, 4294967168  ;;  %s420_s28 = sand.u32 1, %s2299_s25   ;;  %s424_s29 = scalar_lea.vmem [#allocation5], %s2418_s1 }
  0x95   : > { %s421_s16 = scalar_lea.sflag [#allocation6], %s420_s28 }
  0x96   : > { %2108 = dma.done.wait (%p2700_p8), %s421_s16, 256  }
  0x97   : > { %2110 = vsyncadd (%p2700_p8), %s421_s16, 4294967040  ;;  %s433_s11 = scalar_lea.vmem [#allocation7], %s2418_s1  ;;  %p2701_p9 = scmp.eq.s32.totalorder %s2299_s25, 0 }
  0x99   : > { %2112 = dma.done.wait (%p2701_p9), [#allocation9], 16   ;;  %p2702_p12 = pmov %p2701_p9 }
  0x9a   : > { %v2139_v0 = vmov 0.0|0.0   ;;  %vm2140_vm0 = vmmov 0   ;;  %v2141_v1 = vmov 0.0   ;;  %v489_v2 = vld [vmem:[%s2645_s3] sm:$0xff]  ;;  %v490_v3 = vld [vmem:[%s2645_s3 + $0x8] sm:$0xff]  ;;  %v491_v4 = vld [vmem:[%s2645_s3 + $0x10] sm:$0xff] }
  0x9b   : > { %2114 = vsyncadd (%p2702_p12), [#allocation9], 4294967280  ;;  %1819 = vmatprep.subr.bf16.mxu1 %v2139_v0  ;;  %1735 = vmatprep.mubr.msk.f32.mxu1 %vm2140_vm0, %v2141_v1  ;;  %v1820_v5 = vpack.c.bf16 %v490_v3, %v489_v2  ;;  %v492_v6 = vld [vmem:[%s2645_s3 + $0x18] sm:$0xff]  ;;  %v574_v8 = vld [vmem:[%s2646_s4] sm:$0xff]  ;;  %vm500_vm1 = vcmask 261120   ;;  %vm742_vm2 = vcmask 130048  }
  0x9c   : > { %1831 = vmatprep.subr.bf16.mxu0 %v2139_v0  ;;  %1757 = vmatprep.mubr.msk.f32.mxu0 %vm2140_vm0, %v2141_v1  ;;  %v1823_v7 = vpack.c.bf16 %v492_v6, %v491_v4  ;;  %v575_v9 = vld [vmem:[%s2646_s4 + $0x8] sm:$0xff]  ;;  %v576_v12 = vld [vmem:[%s2646_s4 + $0x10] sm:$0xff]  ;;  %v577_v13 = vld [vmem:[%s2646_s4 + $0x18] sm:$0xff]  ;;  %s2143_s19 = smov 112   ;;  %s2144_s26 = smov 80   ;;  %vm820_vm3 = vcmask 64512  }
  0x9d   : > { %1821 = vmatpush3.bf16.msra.mxu1 %v1820_v5  ;;  %v486_v10 = vld [vmem:[%s415_s0] sm:$0xff]  ;;  %v1826_v11 = vpack.c.bf16 %v575_v9, %v574_v8  ;;  %v1829_v14 = vpack.c.bf16 %v577_v13, %v576_v12  ;;  %v487_v15 = vld [vmem:[%s424_s29] sm:$0xff]  ;;  %s2703_s24 = sld [smem:[#allocation24_spill]]  ;;  %vm1418_vm4 = vcmask 392192   ;;  %vm1435_vm5 = vcmask 523264   ;;  %s2705_s28 = sld [smem:[#allocation25_spill]] }
  0x9e   : > { %1822 = vmatprep.subr.bf16.mxu1 %v2139_v0  ;;  %v658_v16 = vld [vmem:[%s2647_s5] sm:$0xff]  ;;  %v659_v17 = vld [vmem:[%s2647_s5 + $0x8] sm:$0xff]  ;;  %v660_v18 = vld [vmem:[%s2647_s5 + $0x10] sm:$0xff]  ;;  %s2704_s12 = sld [smem:[#allocation20_spill]]  ;;  %s1684_s0 = sshll.u32 %s2299_s25, 7 }
  0x9f   : > { %v1832_v19 = vpack.c.bf16 %v659_v17, %v658_v16  ;;  %v661_v20 = vld [vmem:[%s2647_s5 + $0x18] sm:$0xff]  ;;  %v488_v22 = vld [vmem:[%s433_s11] sm:$0xff]  ;;  %s2142_s11 = smov 96   ;;  %v1667_v31 = vld [vmem:[#allocation8] ss:$0 sm:$0xff]  ;;  %s485_s16 = scalar_lea.vmem [#allocation10], %s2418_s1 }
  0xa0   : > { %v1835_v21 = vpack.c.bf16 %v661_v20, %v660_v18  ;;  %v1665_v25 = vld [vmem:[%s2649_s7] ss:$0 sm:$0xff]  ;;  %s1524_s14 = sshll.u32 %s485_s16, 4  ;;  %s2706_s9 = sld [smem:[#allocation26_spill]]  ;;  %s2599_s14 = int_to_ptr.vmem [resolvable:$true] %s1524_s14 }
  0xa1   : > { %1824 = vmatpush3.bf16.msra.mxu1 %v1823_v7  ;;  %1833 = vmatpush3.bf16.msra.mxu0 %v1832_v19  ;;  %v1663_v29 = vld [vmem:[%s2648_s6] ss:$0 sm:$0xff]  ;;  %s1511_s10 = scalar_lea.sflag [#allocation4], %s2415_s23  ;;  %s2059_s15 = scalar_lea.vmem %s2599_s14, 128 }
  0xa2   : > { %1825 = vmatprep.subr.bf16.mxu1 %v2139_v0  ;;  %1834 = vmatprep.subr.bf16.mxu0 %v2139_v0  ;;  %p2060_p10 = scmp.ne.s32.totalorder %s2599_s14, %s2059_s15  ;;  %s2148_s25 = smov [#allocation10]  }
  0xa3   : > { %s2063_s1 = sshll.u32 %s2148_s25, 4  ;;  %s2064_s1 = int_to_ptr.vmem [resolvable:$false] %s2063_s1 }
  0xa4   : > { %1736 = vmatmul.mubr.msk.f32.vlgmr.msra.gmra.mrb[0].mxu1 %vm500_vm1, %v486_v10  ;;  %p2707_p3 = scmp.ne.s32.totalorder %s2704_s12, 0  ;;  %s2065_s13 = scalar_lea.vmem %s2064_s1, 256 }
  0xa5   : > { %1827 = vmatpush3.bf16.msra.mxu1 %v1826_v11  ;;  %1746 = vmatprep.mubr.msk.f32.mxu1 %vm2140_vm0, %v2141_v1  ;;  %p2066_p6 = scmp.lt.s32.totalorder %s2599_s14, %s2064_s1  ;;  %p2067_p5 = scmp.lt.s32.totalorder %s2065_s13, %s2059_s15 }
  0xa6   : > { %1828 = vmatprep.subr.bf16.mxu1 %v2139_v0  ;;  %1836 = vmatpush3.bf16.msra.mxu0 %v1835_v21  ;;  %s2597_s29 = scalar_lea.hbm %s2706_s9, %s1684_s0  ;;  %p2061_p13 = pnand %p2060_p10, %p2707_p3 }
  0xa7   : > { %1770 = vmatprep.subr.mxu0 %v2141_v1  ;;  %p2068_p1 = por %p2067_p5, %p2066_p6 }
  0xa8   : > { %p2062_p4 = pneg %p2061_p13 }
  0xa9   : > { %1830 = vmatpush3.bf16.msra.mxu1 %v1829_v14  ;;  %1758 = vmatmul.mubr.msk.f32.vlgmr.msra.gmra.mrb[0].mxu0 %vm500_vm1, %v488_v22 }
  0xaa   : > { %1760 = vmatprep.subr.mxu1 %v2141_v1  ;;  %1772 = vmatprep.mubr.msk.f32.mxu0 %vm2140_vm0, %v2141_v1  ;;  %p2069_p7 = pnand %p2068_p1, %p2062_p4 }
  0xac   : > { %1747 = vmatmul.mubr.msk.f32.vlgmr.msra.gmra.mrb[2].mxu1 %vm500_vm1, %v487_v15 }
  0xad   : > { %1762 = vmatprep.mubr.msk.f32.mxu1 %vm2140_vm0, %v2141_v1 }
 0x177   : > { %v570_v23 = vpop.f32.mrb[0].mxu1 }
 0x178   : > { %v1737_v24 = vpop.f32.mrb[1].mxu1  ;;  %v571_v30 = vadd.f32 %v1663_v29, %v570_v23 }
 0x17c   : > { %v738_v32 = vpop.f32.mrb[0].mxu0 }
 0x17d   : > { %v2515_v33 = vadd.f32 %v1667_v31, %v738_v32  ;;  %v1759_v34 = vpop.f32.mrb[1].mxu0  ;;  %v1421_v31 = vld [vmem:[%s2703_s24 + $0x8] sm:$0xff]  ;;  %v1422_v32 = vld [vmem:[%s2703_s24 + $0x10] sm:$0xff] }
 0x17f   : > { %v654_v26 = vpop.f32.mrb[2].mxu1 }
 0x180   : > { %v655_v27 = vadd.f32 %v1665_v25, %v654_v26  ;;  %v1748_v28 = vpop.f32.mrb[3].mxu1 }
 0x182   : > { %1074 = vrot.lane.b32.xlu1 %v655_v27, %s2142_s11  ;;  %907 = vrot.lane.b32.xlu0 %v655_v27, %s2143_s19 }
 0x183   : > { %1761 = vmatpush3.xpose.msk.msra.mxu1 %vm742_vm2, %v655_v27 }
 0x184   : > { %1765 = vmatprep.subr.mxu1 %v2141_v1 }
 0x186   : > { %1763 = vmatmul.mubr.msk.f32.vlgmr.msra.gmra.mrb[4].mxu1 %vm742_vm2, %v571_v30  ;;  %1072 = vrot.lane.b32.xlu1 %v571_v30, %s2142_s11 }
 0x187   : > { %905 = vrot.lane.b32.xlu0 %v571_v30, %s2143_s19  ;;  %1767 = vmatprep.mubr.msk.f32.mxu1 %vm2140_vm0, %v2141_v1 }
 0x188   : > { %1766 = vmatpush3.msra.mxu1 %v2515_v33 }
 0x189   : > { %1775 = vmatprep.subr.mxu1 %v2141_v1 }
 0x18a   : > { %1238 = vrot.lane.b32.xlu1 %v571_v30, %s2144_s26  ;;  %v1420_v30 = vld [vmem:[%s2703_s24] sm:$0xff] }
 0x18b   : > { %1240 = vrot.lane.b32.xlu0 %v655_v27, %s2144_s26 }
 0x1f4   : > { %v908_v35 = vpop.permute.xlu0 %907  ;;  %v1075_v36 = vpop.permute.xlu1 %1074 }
 0x1f5   : > { %1771 = vmatpush3.xpose.msk.msra.mxu0 %vm742_vm2, %v908_v35 }
 0x1f6   : > { %1780 = vmatprep.subr.mxu0 %v2141_v1 }
 0x1f8   : > { %v1073_v38 = vpop.permute.xlu1 %1072 }
 0x1f9   : > { %v906_v37 = vpop.permute.xlu0 %905 }
 0x1fa   : > { %1773 = vmatmul.mubr.msk.f32.vlgmr.msra.gmra.mrb[2].mxu0 %vm742_vm2, %v906_v37  ;;  %v1424_v37 = vld [vmem:[%s2703_s24 + $0x20] sm:$0xff] }
 0x1fb   : > { %1781 = vmatpush3.xpose.msk.msra.mxu0 %vm742_vm2, %v1075_v36  ;;  %1782 = vmatprep.mubr.msk.f32.mxu0 %vm2140_vm0, %v2141_v1 }
 0x1fc   : > { %1790 = vmatprep.subr.mxu0 %v2141_v1  ;;  %v1239_v40 = vpop.permute.xlu1 %1238 }
 0x1fd   : > { %v1241_v39 = vpop.permute.xlu0 %1240 }
 0x1fe   : > { %1783 = vmatmul.mubr.msk.f32.vlgmr.msra.gmra.mrb[4].mxu0 %vm742_vm2, %v1073_v38  ;;  %v1425_v38 = vld [vmem:[%s2703_s24 + $0x28] sm:$0xff] }
 0x1ff   : > { %1791 = vmatpush3.xpose.msk.msra.mxu0 %vm742_vm2, %v1241_v39  ;;  %1792 = vmatprep.mubr.msk.f32.mxu0 %vm2140_vm0, %v2141_v1  ;;  %v1844_v39 = vpack.c.bf16 %v1425_v38, %v1424_v37 }
 0x200   : > { %1837 = vmatprep.subr.bf16.mxu0 %v2139_v0 }
 0x202   : > { %1793 = vmatmul.mubr.msk.f32.vlgmr.msra.gmra.mrb[6].mxu0 %vm742_vm2, %v1239_v40  ;;  %v1426_v40 = vld [vmem:[%s2703_s24 + $0x30] sm:$0xff] }
 0x203   : > { %1816 = vmatprep.mubr.msk.f32.mxu0 %vm2140_vm0, %v2141_v1 }
 0x259   : > { %v815_v41 = vpop.f32.mrb[4].mxu1 }
 0x25a   : > { %v819_v42 = vmul.f32 0.25, %v815_v41  ;;  %v1764_v43 = vpop.f32.mrb[5].mxu1  ;;  %v1427_v41 = vld [vmem:[%s2703_s24 + $0x38] sm:$0xff] }
 0x25c   : > { %v821_v44 = vsel %vm820_vm3, %v819_v42, -inf }
 0x25d   : > { %822 = vmax.xlane.f32.xlu0 %v821_v44 }
 0x2cd   : > { %v979_v45 = vpop.f32.mrb[2].mxu0 }
 0x2ce   : > { %v983_v46 = vmul.f32 0.25, %v979_v45  ;;  %v1774_v47 = vpop.f32.mrb[3].mxu0 }
 0x2d0   : > { %v984_v48 = vsel %vm820_vm3, %v983_v46, -inf }
 0x2d1   : > { %985 = vmax.xlane.f32.xlu1 %v984_v48  ;;  %v1146_v49 = vpop.f32.mrb[4].mxu0 }
 0x2d2   : > { %v1150_v50 = vmul.f32 0.25, %v1146_v49  ;;  %v1784_v51 = vpop.f32.mrb[5].mxu0 }
 0x2d4   : > { %v1151_v52 = vsel %vm820_vm3, %v1150_v50, -inf }
 0x2d5   : > { %v1312_v53 = vpop.f32.mrb[6].mxu0  ;;  %1152 = vmax.xlane.f32.xlu0 %v1151_v52 }
 0x2d6   : > { %v1316_v54 = vmul.f32 0.25, %v1312_v53  ;;  %v1794_v55 = vpop.f32.mrb[7].mxu0 }
 0x2d8   : > { %v1317_v56 = vsel %vm820_vm3, %v1316_v54, -inf }
 0x2d9   : > { %1318 = vmax.xlane.f32.xlu0 %v1317_v56 }
 0x2e2   : > { %996 = vrot.lane.b32.xlu1 %v2515_v33, %s2143_s19  ;;  %s2146_s19 = smov 32  }
 0x2ea   : > { %v823_v57 = vpop.xlane.xlu0 %822 }
 0x2eb   : > { %v824_v58 = vsub.f32 %v819_v42, %v823_v57  ;;  %v1847_v42 = vpack.c.bf16 %v1427_v41, %v1426_v40 }
 0x2ed   : > { %v825_v59 = vmul.f32 1.442695, %v824_v58 }
 0x2ef   : > { %1925 = vpow2.f32 %v825_v59 }
 0x2f9   : > { %v1926_v60 = vpop.eup %1925 }
 0x2fa   : > { %v827_v61 = vsel %vm820_vm3, %v1926_v60, 0.0 }
 0x306   : > { %828 = vadd.xlane.f32.xlu1 %v827_v61 }
 0x35e   : > { %v986_v62 = vpop.xlane.xlu1 %985 }
 0x35f   : > { %v987_v63 = vsub.f32 %v983_v46, %v986_v62 }
 0x361   : > { %v988_v2 = vmul.f32 1.442695, %v987_v63 }
 0x362   : > { %v1153_v3 = vpop.xlane.xlu0 %1152  ;;  %v997_v15 = vpop.permute.xlu1 %996 }
 0x363   : > { %1927 = vpow2.f32 %v988_v2  ;;  %v1154_v4 = vsub.f32 %v1150_v50, %v1153_v3 }
 0x365   : > { %v1155_v5 = vmul.f32 1.442695, %v1154_v4 }
 0x366   : > { %v1319_v6 = vpop.xlane.xlu0 %1318 }
 0x367   : > { %1929 = vpow2.f32 %v1155_v5  ;;  %v1320_v7 = vsub.f32 %v1316_v54, %v1319_v6  ;;  %v1681_v54 = vld [vmem:[%s2705_s28] ss:$0 sm:$0xff] }
 0x369   : > { %v1321_v8 = vmul.f32 1.442695, %v1320_v7 }
 0x36b   : > { %1931 = vpow2.f32 %v1321_v8 }
 0x36d   : > { %v1928_v9 = vpop.eup %1927 }
 0x36e   : > { %v990_v10 = vsel %vm820_vm3, %v1928_v9, 0.0 }
 0x36f   : > { %991 = vadd.xlane.f32.xlu0 %v990_v10 }
 0x371   : > { %v1930_v11 = vpop.eup %1929 }
 0x372   : > { %v1157_v12 = vsel %vm820_vm3, %v1930_v11, 0.0 }
 0x373   : > { %1158 = vadd.xlane.f32.xlu1 %v1157_v12 }
 0x375   : > { %v1932_v13 = vpop.eup %1931 }
 0x376   : > { %v1323_v14 = vsel %vm820_vm3, %v1932_v13, 0.0 }
 0x377   : > { %1324 = vadd.xlane.f32.xlu0 %v1323_v14 }
 0x384   : > { %1328 = vrot.lane.b32.xlu1 %v2515_v33, %s2144_s26  ;;  %s2147_s26 = smov 48  }
 0x38d   : > { %1162 = vrot.lane.b32.xlu0 %v2515_v33, %s2142_s11  ;;  %v1838_v33 = vpack.c.bf16 %v1421_v31, %v1420_v30  ;;  %s2145_s11 = smov 16  }
 0x38f   : > { %1839 = vmatpush3.bf16.msra.mxu0 %v1838_v33 }
 0x390   : > { %1840 = vmatprep.subr.bf16.mxu0 %v2139_v0 }
 0x393   : > { %v829_v16 = vpop.xlane.xlu1 %828 }
 0x394   : > { %1933 = vrcp.f32 %v829_v16 }
 0x39e   : > { %v1934_v17 = vpop.eup %1933 }
 0x39f   : > { %v831_v18 = vmul.f32 %v1934_v17, %v1926_v60 }
 0x3a1   : > { %1768 = vmatmul.mubr.msk.f32.vlgmr.msra.gmra.mrb[6].mxu1 %vm820_vm3, %v831_v18 }
 0x3a2   : > { %1776 = vmatpush3.msra.mxu1 %v997_v15  ;;  %1777 = vmatprep.mubr.msk.f32.mxu1 %vm2140_vm0, %v2141_v1 }
 0x3a3   : > { %1785 = vmatprep.subr.mxu1 %v2141_v1 }
 0x3fc   : > { %v992_v19 = vpop.xlane.xlu0 %991 }
 0x3fd   : > { %1935 = vrcp.f32 %v992_v19 }
 0x400   : > { %v1159_v20 = vpop.xlane.xlu1 %1158 }
 0x401   : > { %1937 = vrcp.f32 %v1159_v20 }
 0x404   : > { %v1325_v21 = vpop.xlane.xlu0 %1324  ;;  %v1329_v27 = vpop.permute.xlu1 %1328 }
 0x405   : > { %1939 = vrcp.f32 %v1325_v21 }
 0x407   : > { %v1936_v22 = vpop.eup %1935 }
 0x408   : > { %v994_v23 = vmul.f32 %v1936_v22, %v1928_v9  ;;  %v1163_v24 = vpop.permute.xlu0 %1162 }
 0x40a   : > { %1778 = vmatmul.mubr.msk.f32.vlgmr.msra.gmra.mrb[8].mxu1 %vm820_vm3, %v994_v23 }
 0x40b   : > { %v1938_v25 = vpop.eup %1937  ;;  %1786 = vmatpush3.msra.mxu1 %v1163_v24  ;;  %1787 = vmatprep.mubr.msk.f32.mxu1 %vm2140_vm0, %v2141_v1 }
 0x40c   : > { %v1161_v26 = vmul.f32 %v1938_v25, %v1930_v11  ;;  %1795 = vmatprep.subr.mxu1 %v2141_v1 }
 0x40e   : > { %1788 = vmatmul.mubr.msk.f32.vlgmr.msra.gmra.mrb[10].mxu1 %vm820_vm3, %v1161_v26 }
 0x40f   : > { %v1940_v28 = vpop.eup %1939  ;;  %1796 = vmatpush3.msra.mxu1 %v1329_v27  ;;  %1797 = vmatprep.mubr.msk.f32.mxu1 %vm2140_vm0, %v2141_v1  ;;  %v1423_v1 = vld [vmem:[%s2703_s24 + $0x18] sm:$0xff] }
 0x410   : > { %v1327_v29 = vmul.f32 %v1940_v28, %v1932_v13  ;;  %v1841_v34 = vpack.c.bf16 %v1423_v1, %v1422_v32 }
 0x412   : > { %1798 = vmatmul.mubr.msk.f32.vlgmr.msra.gmra.mrb[12].mxu1 %vm820_vm3, %v1327_v29  ;;  %1842 = vmatpush3.bf16.msra.mxu0 %v1841_v34 }
 0x413   : > { %1843 = vmatprep.subr.bf16.mxu0 %v2139_v0 }
 0x416   : > { %1845 = vmatpush3.bf16.msra.mxu0 %v1844_v39 }
 0x417   : > { %1846 = vmatprep.subr.bf16.mxu0 %v2139_v0 }
 0x41a   : > { %1848 = vmatpush3.bf16.msra.mxu0 %v1847_v42 }
 0x474   : > { %v901_v35 = vpop.f32.mrb[6].mxu1 }
 0x475   : > { %v1769_v36 = vpop.f32.mrb[7].mxu1 }
 0x4dd   : > { %v1068_v43 = vpop.f32.mrb[8].mxu1 }
 0x4de   : > { %1405 = vrot.lane.b32.xlu1 %v1068_v43, %s2145_s11  ;;  %v1779_v44 = vpop.f32.mrb[9].mxu1 }
 0x4e1   : > { %v1234_v45 = vpop.f32.mrb[10].mxu1 }
 0x4e2   : > { %1409 = vrot.lane.b32.xlu0 %v1234_v45, %s2146_s19  ;;  %v1789_v46 = vpop.f32.mrb[11].mxu1 }
 0x4e5   : > { %v1400_v0 = vpop.f32.mrb[12].mxu1 }
 0x4e6   : > { %1413 = vrot.lane.b32.xlu1 %v1400_v0, %s2147_s26  ;;  %v1799_v47 = vpop.f32.mrb[13].mxu1 }
 0x550   : > { %v1406_v48 = vpop.permute.xlu1 %1405 }
 0x551   : > { %v1416_v50 = vsel %vm742_vm2, %v901_v35, %v1406_v48 }
 0x554   : > { %v1410_v49 = vpop.permute.xlu0 %1409 }
 0x555   : > { %v1417_v51 = vsel %vm500_vm1, %v1416_v50, %v1410_v49 }
 0x558   : > { %v1414_v52 = vpop.permute.xlu1 %1413 }
 0x559   : > { %v1419_v53 = vsel %vm1418_vm4, %v1417_v51, %v1414_v52 }
 0x55a   : > { %1817 = vmatmul.mubr.msk.f32.vlgmr.msra.gmra.mrb[8].mxu0 %vm1435_vm5, %v1419_v53 }
 0x62d   : > { %v1505_v55 = vpop.f32.mrb[8].mxu0 }
 0x62e   : > { %v1506_v56 = vadd.f32 %v1681_v54, %v1505_v55  ;;  %v1818_v57 = vpop.f32.mrb[9].mxu0 }
 0x630   : > { %1509 = vst.msk [vmem:[%s485_s16] sm:$0xff] %vm500_vm1, %v1506_v56 }
 0x631   : > { %2072 = shalt.err (!%p2069_p7)
}
 0x632   : > { %s2073_s23 = scalar_lea.hbm %s2597_s29, 128  ;;  %s2077_s11 = scalar_lea.hbm %s2706_s9, 256 }
 0x633   : > { %p2074_p0 = scmp.ne.s32.totalorder %s2597_s29, %s2073_s23  ;;  %p2078_p8 = scmp.lt.u32.totalorder %s2597_s29, %s2706_s9 }
 0x634   : > { %p2079_p9 = scmp.lt.u32.totalorder %s2077_s11, %s2073_s23  ;;  %p2081_p10 = scmp.lt.u32.totalorder %s2073_s23, %s2597_s29 }
 0x635   : > { %p2075_p2 = pnand %p2074_p0, %p2707_p3 }
 0x636   : > { %p2080_p12 = por %p2079_p9, %p2078_p8 }
 0x637   : > { %p2076_p11 = pneg %p2075_p2 }
 0x638   : > { %p2082_p13 = por %p2081_p10, %p2080_p12 }
 0x63a   : > { %p2083_p4 = pnand %p2082_p13, %p2076_p11 }
 0x63c   : > { %2086 = shalt.err (!%p2083_p4)
}
 0x63d   : > { %1859 = dma.vmem_to_hbm [thread:$0]  (%p2707_p3), %s2599_s14, 128, %s2597_s29, %s1511_s10  }
 0x63e PF: > { %s2708_s21 = sld [smem:[#allocation15_spill]]  ;;  %s2709_s17 = sld [smem:[#allocation21_spill]] }
 0x63f   : > { %s2710_s28 = sld [smem:[#allocation17_spill]] }
 0x644   : > { %s1536_s0 = sand.u32 1, %s2708_s21   ;;  %p2711_p6 = scmp.ne.s32.totalorder %s2709_s17, 0 }
 0x645   : > { %p2712_p5 = scmp.ge.s32.totalorder %s2710_s28, 2  ;;  %s1537_s16 = scalar_lea.sflag [#allocation4], %s1536_s0 }
 0x647   : > { %p1876_p1 = pnand %p2712_p5, %p2711_p6 }
 0x649   : > { %2116 = dma.done.wait (!%p1876_p1), %s1537_s16, 128  }
 0x64a   : > { %2118 = vsyncadd (!%p1876_p1), %s1537_s16, 4294967168  ;;  %s2713_s20 = sld [smem:[#allocation18_spill]]  ;;  %s2714_s27 = sld [smem:[#allocation16_spill]] }
 0x64b   : > { %s2715_s19 = sld [smem:[#allocation19_spill]]  ;;  %s2716_s17 = smov %s2125_s18 }
 0x650   : > { %p28_p7 = scmp.ge.s32.totalorder %s2713_s20, 4   ;;  %s2717_s18 = smov %s2714_s27 }
 0x652   :  { %30 = sbr.rel (!%p28_p7) target bundleno = 14 (0xe), region = 137 }
 0x659   :  { %1542 = vsyncpa [#allocation3], 1 }
 0x65a   :  { %1544 = vsyncpa [#allocation3 + $0x1], 1 }
 0x65b   :  { %1545 = vsyncpa [#allocation6], 1 }
 0x65c   :  { %1547 = vsyncpa [#allocation6 + $0x1], 1 }
 0x65d   :  { %1548 = vsyncpa [#allocation9], 1 }
 0x65e   :  { %1549 = vsyncpa [#allocation4], 1 }
 0x65f   :  { %1551 = vsyncpa [#allocation4 + $0x1], 1 }

</bundles_post_ra>
